<compile_context>
chip_gen: v7x
topology: tpu7x:2x2x1
jax: 0.10.0
libtpu: 0.0.40
codegen_flags: <defaults>
</compile_context>

<pallas_src>
import functools

import numpy as np
import jax
import jax.numpy as jnp
from jax.experimental import pallas as pl
from jax.experimental.pallas import tpu as pltpu

W = 125        # spatial width after the (w c) split (hard-coded in the module)
C = 8          # channels after the split (hard-coded in the module)
WC = W * C     # 1000 flattened (w c) columns
W_PAD = 128    # lane-aligned selector width (last 3 columns are all-zero)


def _restruct_kernel(x_ref, sel_ref, o_ref):
    """One H-tile of the channel gather.

    x_ref   : VMEM (TH, WC)     -- tile of the squeezed input image (native dtype)
    sel_ref : VMEM (WC, W_PAD)  -- one-hot selector, fetched once (constant block)
    o_ref   : VMEM (TH, W)      -- output tile; o[:, w] = x[:, 8*w + idx]
    """
    # Exact cross-lane gather on the MXU: each output element gets exactly one
    # 1.0 * x contribution; all other K-terms are exact zeros.
    acc = jnp.dot(x_ref[...], sel_ref[...], preferred_element_type=jnp.float32)
    # Lane-aligned 128-wide result; store only the 125 real columns.
    o_ref[...] = acc[:, :W].astype(o_ref.dtype)


def _pick_tile_h(h: int, tile_h: int) -> int:
    """8-row-aligned H tile; aims for >=4 tiles at large h (megacore balance)."""
    if h <= tile_h:
        if h >= 512:
            t = max(256, ((-(-h // 4)) // 8) * 8)   # ~h/4, 8-aligned, >=256 rows
            return min(t, h)
        return h                                    # full extent is always legal
    return max(8, (min(tile_h, h) // 8) * 8)        # partial tiles must be 8-aligned


@functools.partial(jax.jit, static_argnames=("tile_h", "use_pallas"))
def restruct(img, idx, *, tile_h=1024, use_pallas=None):
    """JAX/Pallas equivalent of restruct(idx).forward(img). `idx` is a runtime scalar."""
    x = jnp.squeeze(img)             # matches torch.squeeze: drops ALL size-1 dims
    if x.ndim != 2 or x.shape[1] != WC:
        raise ValueError(f"expected squeezed image of shape (h, {WC}), got {x.shape}")
    h = x.shape[0]
    out_dtype = x.dtype

    # Run in the input's native dtype when it is MXU-friendly (no extra HBM
    # cast pass); otherwise compute in f32 and cast back (value-preserving).
    if x.dtype == jnp.float32 or x.dtype == jnp.bfloat16:
        compute_dtype = x.dtype
    else:
        compute_dtype = np.dtype(jnp.float32)
    x = x.astype(compute_dtype)
    idx = jnp.asarray(idx, dtype=jnp.int32)

    if use_pallas is None:
        # Tiny images: a plain XLA strided gather beats the kernel launch overhead.
        use_pallas = h >= 128
    if not use_pallas:
        out = jnp.transpose(x.reshape(h, W, C), (2, 0, 1))[idx]
        return out[None, :, :].astype(out_dtype)

    # One-hot selector, built ONCE (hoisted out of the per-tile body):
    # sel[k, w] = 1 iff k == 8*w + idx.  Columns w >= 125 have 8*w + idx >= 1000
    # so they are all-zero (and are never stored).  0.0/1.0 are exact in bf16.
    k = jnp.arange(WC, dtype=jnp.int32)[:, None]        # (1000, 1)
    wcol = jnp.arange(W_PAD, dtype=jnp.int32)[None, :]  # (1, 128)
    sel = (k == C * wcol + idx).astype(compute_dtype)   # (1000, 128)

    th = _pick_tile_h(h, tile_h)
    itemsize = np.dtype(compute_dtype).itemsize
    # Double-buffered input/output tiles + resident selector + headroom;
    # capped at 48 MiB so it stays safe on v7x's 64 MiB VMEM per TensorCore.
    vmem_needed = (2 * th * WC + 2 * th * W_PAD + 2 * WC * W_PAD) * itemsize
    vmem_limit = int(min(max(vmem_needed + (4 << 20), 16 << 20), 48 << 20))

    out2d = pl.pallas_call(
        _restruct_kernel,
        out_shape=jax.ShapeDtypeStruct((h, W), compute_dtype),
        grid_spec=pltpu.PrefetchScalarGridSpec(
            num_scalar_prefetch=0,
            grid=(pl.cdiv(h, th),),
            in_specs=[
                pl.BlockSpec((th, WC), lambda i: (i, 0)),
                pl.BlockSpec((WC, W_PAD), lambda i: (0, 0)),  # fetched once, resident
            ],
            out_specs=pl.BlockSpec((th, W), lambda i: (i, 0)),
        ),
        compiler_params=pltpu.CompilerParams(
            dimension_semantics=("parallel",),   # independent H tiles -> megacore
            vmem_limit_bytes=vmem_limit,
        ),
        cost_estimate=pl.CostEstimate(
            flops=2 * h * WC * W_PAD,
            transcendentals=0,
            bytes_accessed=(h * WC + h * W + WC * W_PAD) * itemsize,
        ),
    )(x, sel)

    # Module output layout: (1, h, 125), original dtype.
    return out2d[None, :, :].astype(out_dtype)


if __name__ == "__main__":
    key = jax.random.PRNGKey(0)
    k1, k2 = jax.random.split(key)

    def reference(img, idx):
        x = jnp.squeeze(img)
        h = x.shape[0]
        return jnp.transpose(x.reshape(h, W, C), (2, 0, 1))[idx][None, :, :]

    # f32 input with a leading singleton dim (so squeeze matters); small tiles
    # so the grid has 4 pipelined H tiles; same compiled fn, runtime idx.
    H1 = 128
    img_f32 = jax.random.normal(k1, (1, H1, WC), dtype=jnp.float32)
    for test_idx in (3, 7):
        out = jax.block_until_ready(restruct(img_f32, test_idx, tile_h=32))
        ref = reference(img_f32, test_idx)
        assert out.shape == (1, H1, W), out.shape
        assert out.dtype == jnp.float32
        # Tight tolerance guards the "exact one-hot gather" claim on the MXU.
        assert jnp.allclose(out, ref, rtol=1e-6, atol=1e-6), "f32 mismatch"

    # Default tile_h path (single full-extent tile at this size).
    out = jax.block_until_ready(restruct(img_f32, 5))
    assert jnp.allclose(out, reference(img_f32, 5), rtol=1e-6, atol=1e-6), "default-tile mismatch"

    # bf16 native-dtype path with a ragged last H tile (196 = 3*64 + 4 rows).
    H2 = 196
    img_bf16 = jax.random.normal(k2, (1, H2, WC), dtype=jnp.float32).astype(jnp.bfloat16)
    out = jax.block_until_ready(restruct(img_bf16, 6, tile_h=64))
    ref = reference(img_bf16, 6)
    assert out.shape == (1, H2, W) and out.dtype == jnp.bfloat16
    assert bool(jnp.all(out == ref)), "bf16 mismatch (gather must be bitwise exact)"

    print("KERNEL_OK")
</pallas_src>

<mosaic_0001>
module attributes {stable_mosaic.version = 11 : i64} {
  func.func @_restruct_kernel(%arg0: i32, %arg1: memref<32x1000xf32, #tpu.memory_space<vmem>>, %arg2: memref<1000x128xf32, #tpu.memory_space<vmem>>, %arg3: memref<32x125xf32, #tpu.memory_space<vmem>>) attributes {dimension_semantics = [#tpu.dimension_semantics<parallel>], iteration_bounds = array<i64: 4>, scalar_prefetch = 0 : i64, scratch_operands = 0 : i64, tpu.core_type = #tpu.core_type<tc>, window_params = [{transform_indices = @transform_0, window_bounds = array<i64: 32, 1000>}, {pipeline_mode = #tpu.pipeline_mode<synchronous>, transform_indices = @transform_1, window_bounds = array<i64: 1000, 128>}, {transform_indices = @transform_2, window_bounds = array<i64: 32, 125>}]} {
    %c0 = arith.constant 0 : index
    %c0_0 = arith.constant 0 : index
    %0 = vector.load %arg1[%c0, %c0_0] : memref<32x1000xf32, #tpu.memory_space<vmem>>, vector<32x1000xf32>
    %c0_1 = arith.constant 0 : index
    %c0_2 = arith.constant 0 : index
    %1 = vector.load %arg2[%c0_1, %c0_2] : memref<1000x128xf32, #tpu.memory_space<vmem>>, vector<1000x128xf32>
    %cst = arith.constant dense<0.000000e+00> : vector<32x128xf32>
    %2 = tpu.matmul %0, %1, %cst {dimension_numbers = #tpu.dot_dimension_numbers<[1], [0], [0], [1], [0, 0, 1, 1], [], []>} : vector<32x1000xf32>, vector<1000x128xf32>, vector<32x128xf32> -> vector<32x128xf32>
    %3 = vector.extract_strided_slice %2 {offsets = [0, 0], sizes = [32, 125], strides = [1, 1]} : vector<32x128xf32> to vector<32x125xf32>
    %c0_3 = arith.constant 0 : index
    %c0_4 = arith.constant 0 : index
    %4 = vector.load %arg3[%c0_3, %c0_4] : memref<32x125xf32, #tpu.memory_space<vmem>>, vector<32x125xf32>
    tpu.vector_store %arg3[%c0_3, %c0_4], %3 {strides = array<i32>} : memref<32x125xf32, #tpu.memory_space<vmem>>, vector<32x125xf32>,
    return
  }
  func.func @transform_0(%arg0: i32) -> (i32, i32) {
    %c0_i32 = arith.constant 0 : i32
    %c0_i32_0 = arith.constant 0 : i32
    return %arg0, %c0_i32 : i32, i32
  }
  func.func @transform_1(%arg0: i32) -> (i32, i32) {
    %c0_i32 = arith.constant 0 : i32
    %c0_i32_0 = arith.constant 0 : i32
    %c0_i32_1 = arith.constant 0 : i32
    return %c0_i32, %c0_i32_0 : i32, i32
  }
  func.func @transform_2(%arg0: i32) -> (i32, i32) {
    %c0_i32 = arith.constant 0 : i32
    %c0_i32_0 = arith.constant 0 : i32
    return %arg0, %c0_i32 : i32, i32
  }
}

</mosaic_0001>

<bundles_post_ra>
// kernel: restruct.1
= control target key start
LH: loop header
LB: loop body
LE: loop exit
PB: predicated region body
PF: predicated region fallthrough
CT: control target
= control target key end

     0   :  { %s1043_s9 = smov 0   ;;  %s1497_s0 = inlined_call_operand.vmem [shape: f32[128,1000], index: 0, kind: input, shape index: {}]   ;;  %s1498_s1 = inlined_call_operand.vmem [shape: f32[1000,128], index: 1, kind: input, shape index: {}]   ;;  %s1499_s2 = inlined_call_operand.vmem [shape: f32[128,125], index: 2, kind: output, shape index: {}]  }
   0x1 LB: > { %s721_s10 = sadd.s32 4294967295, %s1024_s9   ;;  %p725_p0 = scmp.ge.s32.totalorder %s1024_s9, 1  ;;  %s1024_s9 = sphi %s1043_s9, %s12_s9  }
   0x2   : > { %p114_p1 = scmp.lt.s32.totalorder %s1024_s9, 5 }
   0x4   : > { %p115_p2 = pnand %p725_p0, %p114_p1 }
   0x5   : > { %v198_v0 = vld [vmem:[%s1498_s1 + $0x80] sm:$0xff] (!%p115_p2)  ;;  %v199_v1 = vld [vmem:[%s1498_s1 + $0x88] sm:$0xff] (!%p115_p2)  ;;  %v200_v11 = vld [vmem:[%s1498_s1 + $0x90] sm:$0xff] (!%p115_p2)  ;;  %s1096_s15 = sshll.u32 (!%p115_p2), %s721_s10, 2  ;;  %vm307_vm0 = vcmask (!%p115_p2), 850944   ;;  %vm660_vm1 = vcmask (!%p115_p2), 1022976  }
   0x6   : > { %118 = sbr.rel (%p115_p2) target bundleno = 327 (0x147), region = 28  ;;  %v230_v2 = vld [vmem:[%s1498_s1 + $0x180] sm:$0xff] (!%p115_p2)  ;;  %v870_v3 = vpack.c.bf16 (!%p115_p2), %v199_v1, %v198_v0  ;;  %v231_v4 = vld [vmem:[%s1498_s1 + $0x188] sm:$0xff] (!%p115_p2)  ;;  %v201_v13 = vld [vmem:[%s1498_s1 + $0x98] sm:$0xff] (!%p115_p2)  ;;  %p138_p3 = scmp.lt.s32.totalorder (!%p115_p2), %s1096_s15, 15 }
   0x7   : > { %v182_v5 = vld [vmem:[%s1498_s1] sm:$0xff] (!%p115_p2)  ;;  %v183_v6 = vld [vmem:[%s1498_s1 + $0x8] sm:$0xff] (!%p115_p2)  ;;  %v902_v7 = vpack.c.bf16 (!%p115_p2), %v231_v4, %v230_v2  ;;  %v232_v14 = vld [vmem:[%s1498_s1 + $0x190] sm:$0xff] (!%p115_p2)  ;;  %v874_v16 = vpack.c.bf16 (!%p115_p2), %v201_v13, %v200_v11 }
   0x8   : > { %v872_v8 = vpack.c.bf16 (!%p115_p2), %v183_v6, %v182_v5  ;;  %v214_v9 = vld [vmem:[%s1498_s1 + $0x100] sm:$0xff] (!%p115_p2)  ;;  %v215_v10 = vld [vmem:[%s1498_s1 + $0x108] sm:$0xff] (!%p115_p2)  ;;  %871 = vmatprep.subr.bf16.mxu0 (!%p115_p2), %v870_v3  ;;  %v233_v15 = vld [vmem:[%s1498_s1 + $0x198] sm:$0xff] (!%p115_p2) }
   0x9   : > { %v904_v12 = vpack.c.bf16 (!%p115_p2), %v215_v10, %v214_v9  ;;  %903 = vmatprep.subr.bf16.mxu1 (!%p115_p2), %v902_v7  ;;  %v906_v17 = vpack.c.bf16 (!%p115_p2), %v233_v15, %v232_v14  ;;  %v184_v18 = vld [vmem:[%s1498_s1 + $0x10] sm:$0xff] (!%p115_p2)  ;;  %v185_v19 = vld [vmem:[%s1498_s1 + $0x18] sm:$0xff] (!%p115_p2)  ;;  %v202_v23 = vld [vmem:[%s1498_s1 + $0xa0] sm:$0xff] (!%p115_p2) }
   0xa   : > { %873 = vmatpush3.bf16.msra.mxu0 (!%p115_p2), %v872_v8  ;;  %v216_v20 = vld [vmem:[%s1498_s1 + $0x110] sm:$0xff] (!%p115_p2)  ;;  %v876_v21 = vpack.c.bf16 (!%p115_p2), %v185_v19, %v184_v18  ;;  %v217_v22 = vld [vmem:[%s1498_s1 + $0x118] sm:$0xff] (!%p115_p2)  ;;  %v203_v24 = vld [vmem:[%s1498_s1 + $0xa8] sm:$0xff] (!%p115_p2) }
   0xb   : > { %905 = vmatpush3.bf16.msra.mxu1 (!%p115_p2), %v904_v12  ;;  %875 = vmatprep.subr.bf16.mxu0 (!%p115_p2), %v874_v16  ;;  %v908_v25 = vpack.c.bf16 (!%p115_p2), %v217_v22, %v216_v20  ;;  %v878_v26 = vpack.c.bf16 (!%p115_p2), %v203_v24, %v202_v23  ;;  %v234_v27 = vld [vmem:[%s1498_s1 + $0x1a0] sm:$0xff] (!%p115_p2)  ;;  %v235_v28 = vld [vmem:[%s1498_s1 + $0x1a8] sm:$0xff] (!%p115_p2)  ;;  %v204_v35 = vld [vmem:[%s1498_s1 + $0xb0] sm:$0xff] (!%p115_p2) }
   0xc   : > { %907 = vmatprep.subr.bf16.mxu1 (!%p115_p2), %v906_v17  ;;  %v186_v29 = vld [vmem:[%s1498_s1 + $0x20] sm:$0xff] (!%p115_p2)  ;;  %v910_v30 = vpack.c.bf16 (!%p115_p2), %v235_v28, %v234_v27  ;;  %v187_v31 = vld [vmem:[%s1498_s1 + $0x28] sm:$0xff] (!%p115_p2)  ;;  %v205_v36 = vld [vmem:[%s1498_s1 + $0xb8] sm:$0xff] (!%p115_p2) }
   0xd   : > { %v218_v32 = vld [vmem:[%s1498_s1 + $0x120] sm:$0xff]  ;;  %v219_v33 = vld [vmem:[%s1498_s1 + $0x128] sm:$0xff]  ;;  %v880_v34 = vpack.c.bf16 %v187_v31, %v186_v29  ;;  %v236_v37 = vld [vmem:[%s1498_s1 + $0x1b0] sm:$0xff]  ;;  %v882_v39 = vpack.c.bf16 %v205_v36, %v204_v35  ;;  %s1501_s15 = smov (!%p138_p3, %s1096_s15), 15 }
   0xe   : > { %877 = vmatpush3.bf16.msra.mxu0 %v876_v21  ;;  %v912_v38 = vpack.c.bf16 %v219_v33, %v218_v32  ;;  %v237_v40 = vld [vmem:[%s1498_s1 + $0x1b8] sm:$0xff]  ;;  %v188_v41 = vld [vmem:[%s1498_s1 + $0x30] sm:$0xff]  ;;  %v206_v46 = vld [vmem:[%s1498_s1 + $0xc0] sm:$0xff]  ;;  %s737_s10 = sshll.u32 %s1501_s15, 6 }
   0xf   : > { %909 = vmatpush3.bf16.msra.mxu1 %v908_v25  ;;  %879 = vmatprep.subr.bf16.mxu0 %v878_v26  ;;  %v189_v42 = vld [vmem:[%s1498_s1 + $0x38] sm:$0xff]  ;;  %v914_v43 = vpack.c.bf16 %v237_v40, %v236_v37  ;;  %v220_v44 = vld [vmem:[%s1498_s1 + $0x130] sm:$0xff]  ;;  %v207_v47 = vld [vmem:[%s1498_s1 + $0xc8] sm:$0xff]  ;;  %s1213_s8 = scalar_lea.vmem %s1497_s0, %s737_s10 }
  0x10   : > { %911 = vmatprep.subr.bf16.mxu1 %v910_v30  ;;  %v221_v45 = vld [vmem:[%s1498_s1 + $0x138] sm:$0xff]  ;;  %v238_v48 = vld [vmem:[%s1498_s1 + $0x1c0] sm:$0xff]  ;;  %v239_v49 = vld [vmem:[%s1498_s1 + $0x1c8] sm:$0xff]  ;;  %v884_v50 = vpack.c.bf16 %v189_v42, %v188_v41  ;;  %v886_v52 = vpack.c.bf16 %v207_v47, %v206_v46 }
  0x11   : > { %v916_v51 = vpack.c.bf16 %v221_v45, %v220_v44  ;;  %v190_v53 = vld [vmem:[%s1498_s1 + $0x40] sm:$0xff]  ;;  %v191_v54 = vld [vmem:[%s1498_s1 + $0x48] sm:$0xff]  ;;  %v918_v56 = vpack.c.bf16 %v239_v49, %v238_v48  ;;  %v208_v58 = vld [vmem:[%s1498_s1 + $0xd0] sm:$0xff] }
  0x12   : > { %881 = vmatpush3.bf16.msra.mxu0 %v880_v34  ;;  %v222_v55 = vld [vmem:[%s1498_s1 + $0x140] sm:$0xff]  ;;  %v223_v57 = vld [vmem:[%s1498_s1 + $0x148] sm:$0xff]  ;;  %v209_v59 = vld [vmem:[%s1498_s1 + $0xd8] sm:$0xff]  ;;  %v888_v62 = vpack.c.bf16 %v191_v54, %v190_v53 }
  0x13   : > { %913 = vmatpush3.bf16.msra.mxu1 %v912_v38  ;;  %883 = vmatprep.subr.bf16.mxu0 %v882_v39  ;;  %v240_v60 = vld [vmem:[%s1498_s1 + $0x1d0] sm:$0xff]  ;;  %v241_v61 = vld [vmem:[%s1498_s1 + $0x1d8] sm:$0xff]  ;;  %v920_v63 = vpack.c.bf16 %v223_v57, %v222_v55  ;;  %v890_v0 = vpack.c.bf16 %v209_v59, %v208_v58  ;;  %v210_v6 = vld [vmem:[%s1498_s1 + $0xe0] sm:$0xff] }
  0x14   : > { %915 = vmatprep.subr.bf16.mxu1 %v914_v43  ;;  %v192_v1 = vld [vmem:[%s1498_s1 + $0x50] sm:$0xff]  ;;  %v193_v2 = vld [vmem:[%s1498_s1 + $0x58] sm:$0xff]  ;;  %v922_v4 = vpack.c.bf16 %v241_v61, %v240_v60  ;;  %v211_v7 = vld [vmem:[%s1498_s1 + $0xe8] sm:$0xff] }
  0x15   : > { %v224_v3 = vld [vmem:[%s1498_s1 + $0x150] sm:$0xff]  ;;  %v225_v5 = vld [vmem:[%s1498_s1 + $0x158] sm:$0xff]  ;;  %v242_v8 = vld [vmem:[%s1498_s1 + $0x1e0] sm:$0xff]  ;;  %v892_v10 = vpack.c.bf16 %v193_v2, %v192_v1  ;;  %v894_v14 = vpack.c.bf16 %v211_v7, %v210_v6 }
  0x16   : > { %885 = vmatpush3.bf16.msra.mxu0 %v884_v50  ;;  %v243_v9 = vld [vmem:[%s1498_s1 + $0x1e8] sm:$0xff]  ;;  %v194_v11 = vld [vmem:[%s1498_s1 + $0x60] sm:$0xff]  ;;  %v924_v13 = vpack.c.bf16 %v225_v5, %v224_v3  ;;  %v153_v17 = vld [vmem:[%s1213_s8 + $0x18] sm:$0xff] }
  0x17   : > { %917 = vmatpush3.bf16.msra.mxu1 %v916_v51  ;;  %887 = vmatprep.subr.bf16.mxu0 %v886_v52  ;;  %v195_v12 = vld [vmem:[%s1498_s1 + $0x68] sm:$0xff]  ;;  %v226_v15 = vld [vmem:[%s1498_s1 + $0x160] sm:$0xff]  ;;  %v926_v18 = vpack.c.bf16 %v243_v9, %v242_v8  ;;  %v212_v20 = vld [vmem:[%s1498_s1 + $0xf0] sm:$0xff]  ;;  %v1026_v51 = vmov 0.0|0.0  }
  0x18   : > { %919 = vmatprep.subr.bf16.mxu1 %v918_v56  ;;  %v151_v16 = vld [vmem:[%s1213_s8 + $0x8] sm:$0xff]  ;;  %v213_v21 = vld [vmem:[%s1498_s1 + $0xf8] sm:$0xff]  ;;  %v244_v22 = vld [vmem:[%s1498_s1 + $0x1f0] sm:$0xff]  ;;  %469 = vmatprep.mubr.f32.mxu1 %v153_v17  ;;  %v896_v24 = vpack.c.bf16 %v195_v12, %v194_v11 }
  0x19   : > { %v227_v19 = vld [vmem:[%s1498_s1 + $0x168] sm:$0xff]  ;;  %384 = vmatprep.mubr.f32.mxu0 %v151_v16  ;;  %v245_v23 = vld [vmem:[%s1498_s1 + $0x1f8] sm:$0xff]  ;;  %v898_v26 = vpack.c.bf16 %v213_v21, %v212_v20  ;;  %v196_v27 = vld [vmem:[%s1498_s1 + $0x70] sm:$0xff] }
  0x1a   : > { %889 = vmatpush3.bf16.msra.mxu0 %v888_v62  ;;  %v928_v25 = vpack.c.bf16 %v227_v19, %v226_v15  ;;  %v197_v28 = vld [vmem:[%s1498_s1 + $0x78] sm:$0xff]  ;;  %v228_v29 = vld [vmem:[%s1498_s1 + $0x170] sm:$0xff]  ;;  %v930_v30 = vpack.c.bf16 %v245_v23, %v244_v22  ;;  %v262_v32 = vld [vmem:[%s1498_s1 + $0x280] sm:$0xff] }
  0x1b   : > { %921 = vmatpush3.bf16.msra.mxu1 %v920_v63  ;;  %891 = vmatprep.subr.bf16.mxu0 %v890_v0  ;;  %v229_v31 = vld [vmem:[%s1498_s1 + $0x178] sm:$0xff]  ;;  %v263_v33 = vld [vmem:[%s1498_s1 + $0x288] sm:$0xff]  ;;  %v900_v34 = vpack.c.bf16 %v197_v28, %v196_v27  ;;  %v246_v37 = vld [vmem:[%s1498_s1 + $0x200] sm:$0xff] }
  0x1c   : > { %923 = vmatprep.subr.bf16.mxu1 %v922_v4  ;;  %v932_v35 = vpack.c.bf16 %v229_v31, %v228_v29  ;;  %v934_v36 = vpack.c.bf16 %v263_v33, %v262_v32  ;;  %v247_v38 = vld [vmem:[%s1498_s1 + $0x208] sm:$0xff]  ;;  %v278_v39 = vld [vmem:[%s1498_s1 + $0x300] sm:$0xff]  ;;  %v264_v41 = vld [vmem:[%s1498_s1 + $0x290] sm:$0xff] }
  0x1d   : > { %v279_v40 = vld [vmem:[%s1498_s1 + $0x308] sm:$0xff]  ;;  %v265_v42 = vld [vmem:[%s1498_s1 + $0x298] sm:$0xff]  ;;  %v150_v43 = vld [vmem:[%s1213_s8] sm:$0xff]  ;;  %v936_v45 = vpack.c.bf16 %v247_v38, %v246_v37 }
  0x1e   : > { %893 = vmatpush3.bf16.msra.mxu0 %v892_v10  ;;  %v152_v44 = vld [vmem:[%s1213_s8 + $0x10] sm:$0xff]  ;;  %v967_v46 = vpack.c.bf16 %v279_v40, %v278_v39  ;;  %v938_v47 = vpack.c.bf16 %v265_v42, %v264_v41  ;;  %v249_v49 = vld [vmem:[%s1498_s1 + $0x218] sm:$0xff]  ;;  %v266_v53 = vld [vmem:[%s1498_s1 + $0x2a0] sm:$0xff] }
  0x1f   : > { %925 = vmatpush3.bf16.msra.mxu1 %v924_v13  ;;  %895 = vmatprep.subr.bf16.mxu0 %v894_v14  ;;  %v248_v48 = vld [vmem:[%s1498_s1 + $0x210] sm:$0xff]  ;;  %v281_v52 = vld [vmem:[%s1498_s1 + $0x318] sm:$0xff]  ;;  %v267_v54 = vld [vmem:[%s1498_s1 + $0x2a8] sm:$0xff] }
  0x20   : > { %927 = vmatprep.subr.bf16.mxu1 %v926_v18  ;;  %v280_v50 = vld [vmem:[%s1498_s1 + $0x310] sm:$0xff]  ;;  %v159_v55 = vld [vmem:[%s1213_s8 + $0x48] sm:$0xff]  ;;  %v940_v56 = vpack.c.bf16 %v249_v49, %v248_v48  ;;  %v250_v57 = vld [vmem:[%s1498_s1 + $0x220] sm:$0xff]  ;;  %v942_v60 = vpack.c.bf16 %v267_v54, %v266_v53 }
  0x21   : > { %v158_v58 = vld [vmem:[%s1213_s8 + $0x40] sm:$0xff]  ;;  %v970_v59 = vpack.c.bf16 %v281_v52, %v280_v50  ;;  %v251_v61 = vld [vmem:[%s1498_s1 + $0x228] sm:$0xff]  ;;  %v268_v1 = vld [vmem:[%s1498_s1 + $0x2b0] sm:$0xff] }
  0x22   : > { %897 = vmatpush3.bf16.msra.mxu0 %v896_v24  ;;  %v282_v62 = vld [vmem:[%s1498_s1 + $0x320] sm:$0xff]  ;;  %v167_v63 = vld [vmem:[%s1213_s8 + $0x88] sm:$0xff]  ;;  %v269_v2 = vld [vmem:[%s1498_s1 + $0x2b8] sm:$0xff]  ;;  %v944_v3 = vpack.c.bf16 %v251_v61, %v250_v57 }
  0x23   : > { %929 = vmatpush3.bf16.msra.mxu1 %v928_v25  ;;  %899 = vmatprep.subr.bf16.mxu0 %v898_v26  ;;  %v283_v0 = vld [vmem:[%s1498_s1 + $0x328] sm:$0xff]  ;;  %v252_v4 = vld [vmem:[%s1498_s1 + $0x230] sm:$0xff]  ;;  %v253_v5 = vld [vmem:[%s1498_s1 + $0x238] sm:$0xff]  ;;  %v946_v8 = vpack.c.bf16 %v269_v2, %v268_v1 }
  0x24   : > { %931 = vmatprep.subr.bf16.mxu1 %v930_v30  ;;  %v166_v6 = vld [vmem:[%s1213_s8 + $0x80] sm:$0xff]  ;;  %v973_v7 = vpack.c.bf16 %v283_v0, %v282_v62  ;;  %v284_v9 = vld [vmem:[%s1498_s1 + $0x330] sm:$0xff]  ;;  %v285_v10 = vld [vmem:[%s1498_s1 + $0x338] sm:$0xff]  ;;  %v948_v16 = vpack.c.bf16 %v253_v5, %v252_v4 }
  0x25   : > { %v175_v11 = vld [vmem:[%s1213_s8 + $0xc8] sm:$0xff]  ;;  %v270_v12 = vld [vmem:[%s1498_s1 + $0x2c0] sm:$0xff]  ;;  %v161_v14 = vld [vmem:[%s1213_s8 + $0x58] sm:$0xff]  ;;  %v976_v20 = vpack.c.bf16 %v285_v10, %v284_v9 }
  0x26   : > { %901 = vmatpush3.bf16.msra.mxu0 %v900_v34  ;;  %v271_v13 = vld [vmem:[%s1498_s1 + $0x2c8] sm:$0xff]  ;;  %v160_v15 = vld [vmem:[%s1213_s8 + $0x50] sm:$0xff]  ;;  %v254_v17 = vld [vmem:[%s1498_s1 + $0x240] sm:$0xff] }
  0x27   : > { %933 = vmatpush3.bf16.msra.mxu1 %v932_v35  ;;  %935 = vmatprep.subr.bf16.mxu0 %v934_v36  ;;  %v174_v18 = vld [vmem:[%s1213_s8 + $0xc0] sm:$0xff]  ;;  %v169_v19 = vld [vmem:[%s1213_s8 + $0x98] sm:$0xff]  ;;  %v950_v21 = vpack.c.bf16 %v271_v13, %v270_v12  ;;  %v255_v22 = vld [vmem:[%s1498_s1 + $0x248] sm:$0xff] }
  0x28   : > { %966 = vmatprep.subr.bf16.mxu1 %v1026_v51  ;;  %v286_v23 = vld [vmem:[%s1498_s1 + $0x340] sm:$0xff]  ;;  %v155_v24 = vld [vmem:[%s1213_s8 + $0x28] sm:$0xff]  ;;  %v272_v26 = vld [vmem:[%s1498_s1 + $0x2d0] sm:$0xff]  ;;  %v952_v29 = vpack.c.bf16 %v255_v22, %v254_v17 }
  0x29   : > { %385 = vmatmul.mubr.f32.vlgmr.msra.gmra.mrb[0].mxu0 %v150_v43  ;;  %v287_v25 = vld [vmem:[%s1498_s1 + $0x348] sm:$0xff]  ;;  %v273_v27 = vld [vmem:[%s1498_s1 + $0x2d8] sm:$0xff]  ;;  %v168_v28 = vld [vmem:[%s1213_s8 + $0x90] sm:$0xff] }
  0x2a   : > { %470 = vmatmul.mubr.f32.vlgmr.msra.gmra.mrb[0].mxu1 %v152_v44  ;;  %937 = vmatpush3.bf16.msra.mxu0 %v936_v45  ;;  %v177_v30 = vld [vmem:[%s1213_s8 + $0xd8] sm:$0xff]  ;;  %v979_v31 = vpack.c.bf16 %v287_v25, %v286_v23  ;;  %v954_v32 = vpack.c.bf16 %v273_v27, %v272_v26  ;;  %v256_v33 = vld [vmem:[%s1498_s1 + $0x250] sm:$0xff]  ;;  %v274_v37 = vld [vmem:[%s1498_s1 + $0x2e0] sm:$0xff] }
  0x2b   : > { %968 = vmatpush1.bf16.msra.mxu1 %v967_v46  ;;  %939 = vmatprep.subr.bf16.mxu0 %v938_v47  ;;  %v257_v34 = vld [vmem:[%s1498_s1 + $0x258] sm:$0xff]  ;;  %v288_v35 = vld [vmem:[%s1498_s1 + $0x350] sm:$0xff]  ;;  %v275_v38 = vld [vmem:[%s1498_s1 + $0x2e8] sm:$0xff] }
  0x2c   : > { %969 = vmatprep.subr.bf16.mxu1 %v1026_v51  ;;  %389 = vmatprep.mubr.f32.mxu0 %v159_v55  ;;  %v289_v36 = vld [vmem:[%s1498_s1 + $0x358] sm:$0xff]  ;;  %v176_v39 = vld [vmem:[%s1213_s8 + $0xd0] sm:$0xff]  ;;  %v956_v40 = vpack.c.bf16 %v257_v34, %v256_v33  ;;  %v958_v43 = vpack.c.bf16 %v275_v38, %v274_v37  ;;  %v258_v44 = vld [vmem:[%s1498_s1 + $0x260] sm:$0xff] }
  0x2d   : > { %390 = vmatmul.mubr.f32.gmra.mrb[2].mxu0 %v158_v58  ;;  %474 = vmatprep.mubr.f32.mxu1 %v161_v14  ;;  %v157_v41 = vld [vmem:[%s1213_s8 + $0x38] sm:$0xff]  ;;  %v982_v42 = vpack.c.bf16 %v289_v36, %v288_v35  ;;  %v259_v45 = vld [vmem:[%s1498_s1 + $0x268] sm:$0xff]  ;;  %v290_v46 = vld [vmem:[%s1498_s1 + $0x360] sm:$0xff] }
  0x2e   : > { %941 = vmatpush3.bf16.msra.mxu0 %v940_v56  ;;  %394 = vmatprep.mubr.f32.mxu0 %v167_v63  ;;  %v291_v47 = vld [vmem:[%s1498_s1 + $0x368] sm:$0xff]  ;;  %v276_v48 = vld [vmem:[%s1498_s1 + $0x2f0] sm:$0xff]  ;;  %v277_v49 = vld [vmem:[%s1498_s1 + $0x2f8] sm:$0xff]  ;;  %v960_v50 = vpack.c.bf16 %v259_v45, %v258_v44 }
  0x2f   : > { %971 = vmatpush1.bf16.msra.mxu1 %v970_v59  ;;  %943 = vmatprep.subr.bf16.mxu0 %v942_v60  ;;  %v985_v52 = vpack.c.bf16 %v291_v47, %v290_v46  ;;  %v962_v53 = vpack.c.bf16 %v277_v49, %v276_v48  ;;  %v260_v54 = vld [vmem:[%s1498_s1 + $0x270] sm:$0xff]  ;;  %v261_v55 = vld [vmem:[%s1498_s1 + $0x278] sm:$0xff]  ;;  %v294_v60 = vld [vmem:[%s1498_s1 + $0x380] sm:$0xff] }
  0x30   : > { %972 = vmatprep.subr.bf16.mxu1 %v1026_v51  ;;  %475 = vmatmul.mubr.f32.gmra.mrb[2].mxu1 %v160_v15  ;;  %v292_v56 = vld [vmem:[%s1498_s1 + $0x370] sm:$0xff]  ;;  %v293_v57 = vld [vmem:[%s1498_s1 + $0x378] sm:$0xff]  ;;  %v964_v58 = vpack.c.bf16 %v261_v55, %v260_v54  ;;  %v295_v61 = vld [vmem:[%s1498_s1 + $0x388] sm:$0xff] }
  0x31   : > { %395 = vmatmul.mubr.f32.gmra.mrb[4].mxu0 %v166_v6  ;;  %479 = vmatprep.mubr.f32.mxu1 %v169_v19  ;;  %v988_v59 = vpack.c.bf16 %v293_v57, %v292_v56  ;;  %v154_v62 = vld [vmem:[%s1213_s8 + $0x20] sm:$0xff]  ;;  %v991_v63 = vpack.c.bf16 %v295_v61, %v294_v60  ;;  %v163_v0 = vld [vmem:[%s1213_s8 + $0x68] sm:$0xff]  ;;  %v296_v1 = vld [vmem:[%s1498_s1 + $0x390] sm:$0xff] }
  0x32   : > { %945 = vmatpush3.bf16.msra.mxu0 %v944_v3  ;;  %399 = vmatprep.mubr.f32.mxu0 %v175_v11  ;;  %v297_v2 = vld [vmem:[%s1498_s1 + $0x398] sm:$0xff]  ;;  %v162_v3 = vld [vmem:[%s1213_s8 + $0x60] sm:$0xff]  ;;  %v171_v5 = vld [vmem:[%s1213_s8 + $0xa8] sm:$0xff] }
  0x33   : > { %974 = vmatpush1.bf16.msra.mxu1 %v973_v7  ;;  %947 = vmatprep.subr.bf16.mxu0 %v946_v8  ;;  %v994_v4 = vpack.c.bf16 %v297_v2, %v296_v1  ;;  %v298_v6 = vld [vmem:[%s1498_s1 + $0x3a0] sm:$0xff]  ;;  %v299_v7 = vld [vmem:[%s1498_s1 + $0x3a8] sm:$0xff]  ;;  %v300_v11 = vld [vmem:[%s1498_s1 + $0x3b0] sm:$0xff] }
  0x34   : > { %975 = vmatprep.subr.bf16.mxu1 %v1026_v51  ;;  %480 = vmatmul.mubr.f32.gmra.mrb[4].mxu1 %v168_v28  ;;  %v170_v8 = vld [vmem:[%s1213_s8 + $0xa0] sm:$0xff]  ;;  %v997_v9 = vpack.c.bf16 %v299_v7, %v298_v6  ;;  %v179_v10 = vld [vmem:[%s1213_s8 + $0xe8] sm:$0xff]  ;;  %v301_v12 = vld [vmem:[%s1498_s1 + $0x3b8] sm:$0xff] }
  0x35   : > { %400 = vmatmul.mubr.f32.gmra.mrb[6].mxu0 %v174_v18  ;;  %484 = vmatprep.mubr.f32.mxu1 %v177_v30  ;;  %v178_v13 = vld [vmem:[%s1213_s8 + $0xe0] sm:$0xff]  ;;  %v1000_v14 = vpack.c.bf16 %v301_v12, %v300_v11  ;;  %v304_v18 = vld [vmem:[%s1498_s1 + $0x3d0] sm:$0xff]  ;;  %v305_v19 = vld [vmem:[%s1498_s1 + $0x3d8] sm:$0xff] }
  0x36   : > { %949 = vmatpush3.bf16.msra.mxu0 %v948_v16  ;;  %554 = vmatprep.mubr.f32.mxu0 %v155_v24  ;;  %v302_v15 = vld [vmem:[%s1498_s1 + $0x3c0] sm:$0xff]  ;;  %v303_v16 = vld [vmem:[%s1498_s1 + $0x3c8] sm:$0xff]  ;;  %v156_v23 = vld [vmem:[%s1213_s8 + $0x30] sm:$0xff] }
  0x37   : > { %977 = vmatpush1.bf16.msra.mxu1 %v976_v20  ;;  %951 = vmatprep.subr.bf16.mxu0 %v950_v21  ;;  %v1003_v17 = vpack.c.bf16 %v303_v16, %v302_v15  ;;  %v1006_v20 = vpack.c.bf16 %v305_v19, %v304_v18  ;;  %v1027_v21 = vmov 0.0   ;;  %v306_v22 = vld [vmem:[%s1498_s1 + $0x3e0] sm:$0xff]  ;;  %v165_v24 = vld [vmem:[%s1213_s8 + $0x78] sm:$0xff]  ;;  %v164_v25 = vld [vmem:[%s1213_s8 + $0x70] sm:$0xff] }
  0x38   : > { %978 = vmatprep.subr.bf16.mxu1 %v1026_v51  ;;  %485 = vmatmul.mubr.f32.gmra.mrb[6].mxu1 %v176_v39  ;;  %v173_v26 = vld [vmem:[%s1213_s8 + $0xb8] sm:$0xff]  ;;  %v180_v28 = vld [vmem:[%s1213_s8 + $0xf0] sm:$0xff] }
  0x39   : > { %731 = vmatprep.mubr.msk.f32.mxu1 %vm307_vm0, %v157_v41  ;;  %v181_v27 = vld [vmem:[%s1213_s8 + $0xf8] sm:$0xff] }
  0x3a   : > { %953 = vmatpush3.bf16.msra.mxu0 %v952_v29 }
  0x3b   : > { %980 = vmatpush1.bf16.msra.mxu1 %v979_v31  ;;  %955 = vmatprep.subr.bf16.mxu0 %v954_v32 }
  0x3c   : > { %981 = vmatprep.subr.bf16.mxu1 %v1026_v51 }
  0x3e   : > { %957 = vmatpush3.bf16.msra.mxu0 %v956_v40 }
  0x3f   : > { %983 = vmatpush1.bf16.msra.mxu1 %v982_v42  ;;  %959 = vmatprep.subr.bf16.mxu0 %v958_v43 }
  0x40   : > { %984 = vmatprep.subr.bf16.mxu1 %v1026_v51 }
  0x42   : > { %961 = vmatpush3.bf16.msra.mxu0 %v960_v50 }
  0x43   : > { %986 = vmatpush1.bf16.msra.mxu1 %v985_v52  ;;  %963 = vmatprep.subr.bf16.mxu0 %v962_v53 }
  0x44   : > { %987 = vmatprep.subr.bf16.mxu1 %v1026_v51 }
  0x46   : > { %965 = vmatpush3.bf16.msra.mxu0 %v964_v58 }
  0x47   : > { %989 = vmatpush1.bf16.msra.mxu1 %v988_v59 }
  0x48   : > { %990 = vmatprep.subr.bf16.mxu1 %v1026_v51 }
  0x49   : > { %555 = vmatmul.mubr.f32.vlgmr.msra.gmra.mrb[8].mxu0 %v154_v62 }
  0x4a   : > { %559 = vmatprep.mubr.f32.mxu0 %v163_v0 }
  0x4b   : > { %992 = vmatpush1.bf16.msra.mxu1 %v991_v63 }
  0x4c   : > { %993 = vmatprep.subr.bf16.mxu1 %v1026_v51 }
  0x4d   : > { %560 = vmatmul.mubr.f32.gmra.mrb[10].mxu0 %v162_v3 }
  0x4e   : > { %564 = vmatprep.mubr.f32.mxu0 %v171_v5 }
  0x4f   : > { %995 = vmatpush1.bf16.msra.mxu1 %v994_v4 }
  0x50   : > { %996 = vmatprep.subr.bf16.mxu1 %v1026_v51 }
  0x51   : > { %565 = vmatmul.mubr.f32.gmra.mrb[12].mxu0 %v170_v8 }
  0x52   : > { %569 = vmatprep.mubr.f32.mxu0 %v179_v10 }
  0x53   : > { %998 = vmatpush1.bf16.msra.mxu1 %v997_v9 }
  0x54   : > { %999 = vmatprep.subr.bf16.mxu1 %v1026_v51 }
  0x55   : > { %570 = vmatmul.mubr.f32.gmra.mrb[14].mxu0 %v178_v13 }
  0x57   : > { %1001 = vmatpush1.bf16.msra.mxu1 %v1000_v14 }
  0x58   : > { %1002 = vmatprep.subr.bf16.mxu1 %v1026_v51 }
  0x5b   : > { %1004 = vmatpush1.bf16.msra.mxu1 %v1003_v17 }
  0x5c   : > { %1005 = vmatprep.subr.bf16.mxu1 %v1026_v51  ;;  %v172_v51 = vld [vmem:[%s1213_s8 + $0xb0] sm:$0xff]  ;;  %s730_s8 = sshll.u32 %s1501_s15, 3 }
  0x5d   : > { %s148_s13 = scalar_lea.vmem %s1499_s2, %s730_s8 }
  0x5f   : > { %1007 = vmatpush1.bf16.msra.mxu1 %v1006_v20 }
  0x60   : > { %631 = vmatprep.subr.mxu1 %v1027_v21 }
  0x63   : > { %632 = vmatpush1.msra.mxu1 %v306_v22 }
  0x64   : > { %640 = vmatmul.mubr.f32.vlgmr.msra.gmra.mrb[8].mxu1 %v156_v23 }
  0x65   : > { %732 = vmatprep.mubr.msk.f32.mxu1 %vm307_vm0, %v165_v24 }
  0x68   : > { %645 = vmatmul.mubr.f32.gmra.mrb[10].mxu1 %v164_v25 }
  0x69   : > { %733 = vmatprep.mubr.msk.f32.mxu1 %vm307_vm0, %v173_v26 }
  0x6c   : > { %650 = vmatmul.mubr.f32.gmra.mrb[12].mxu1 %v172_v51 }
  0x6d   : > { %734 = vmatprep.mubr.msk.f32.mxu1 %vm307_vm0, %v181_v27 }
  0x70   : > { %655 = vmatmul.mubr.f32.gmra.mrb[14].mxu1 %v180_v28 }
  0xfc   : > { %v770_v29 = vpop.f32.mrb[0].mxu0 }
  0xfd   : > { %v814_v30 = vpop.f32.mrb[0].mxu1  ;;  %v771_v31 = vpop.f32.mrb[1].mxu0 }
  0xfe   : > { %v772_v32 = vadd.f32 %v771_v31, %v770_v29  ;;  %v815_v33 = vpop.f32.mrb[1].mxu1 }
  0xff   : > { %v816_v34 = vadd.f32 %v815_v33, %v814_v30 }
 0x100   : > { %v773_v35 = vpop.f32.mrb[2].mxu0 }
 0x101   : > { %v472_v36 = vadd.f32 %v816_v34, %v772_v32  ;;  %v774_v37 = vpop.f32.mrb[3].mxu0 }
 0x102   : > { %v775_v38 = vadd.f32 %v774_v37, %v773_v35 }
 0x103   : > { %v817_v42 = vpop.f32.mrb[2].mxu1 }
 0x104   : > { %v776_v39 = vpop.f32.mrb[4].mxu0  ;;  %v818_v44 = vpop.f32.mrb[3].mxu1 }
 0x105   : > { %v777_v40 = vpop.f32.mrb[5].mxu0  ;;  %v819_v46 = vadd.f32 %v818_v44, %v817_v42 }
 0x106   : > { %v778_v41 = vadd.f32 %v777_v40, %v776_v39 }
 0x107   : > { %v477_v48 = vadd.f32 %v819_v46, %v775_v38  ;;  %v820_v49 = vpop.f32.mrb[4].mxu1 }
 0x108   : > { %v779_v43 = vpop.f32.mrb[6].mxu0  ;;  %v821_v50 = vpop.f32.mrb[5].mxu1 }
 0x109   : > { %v780_v45 = vpop.f32.mrb[7].mxu0  ;;  %v822_v52 = vadd.f32 %v821_v50, %v820_v49 }
 0x10a   : > { %v781_v47 = vadd.f32 %v780_v45, %v779_v43 }
 0x10b   : > { %v482_v53 = vadd.f32 %v822_v52, %v778_v41  ;;  %v823_v54 = vpop.f32.mrb[6].mxu1 }
 0x10c   : > { %v824_v55 = vpop.f32.mrb[7].mxu1 }
 0x10d   : > { %v825_v56 = vadd.f32 %v824_v55, %v823_v54 }
 0x10f   : > { %v487_v57 = vadd.f32 %v825_v56, %v781_v47 }
 0x11c   : > { %v858_v58 = vpop.f32.mrb[8].mxu0 }
 0x11d   : > { %v859_v59 = vpop.f32.mrb[9].mxu0 }
 0x11e   : > { %v860_v60 = vadd.f32 %v859_v59, %v858_v58 }
 0x120   : > { %v861_v61 = vpop.f32.mrb[10].mxu0  ;;  %v557_v62 = vadd.f32 %v860_v60, %v472_v36 }
 0x121   : > { %v862_v63 = vpop.f32.mrb[11].mxu0 }
 0x122   : > { %v863_v0 = vadd.f32 %v862_v63, %v861_v61 }
 0x124   : > { %v864_v1 = vpop.f32.mrb[12].mxu0  ;;  %v562_v2 = vadd.f32 %v863_v0, %v477_v48 }
 0x125   : > { %v865_v3 = vpop.f32.mrb[13].mxu0 }
 0x126   : > { %v866_v4 = vadd.f32 %v865_v3, %v864_v1 }
 0x128   : > { %v867_v5 = vpop.f32.mrb[14].mxu0  ;;  %v567_v6 = vadd.f32 %v866_v4, %v482_v53 }
 0x129   : > { %v868_v7 = vpop.f32.mrb[15].mxu0 }
 0x12a   : > { %v869_v8 = vadd.f32 %v868_v7, %v867_v5 }
 0x12c   : > { %v572_v9 = vadd.f32 %v869_v8, %v487_v57 }
 0x137   : > { %v641_v10 = vpop.f32.mrb[8].mxu1 }
 0x138   : > { %v642_v11 = vadd.f32 %v641_v10, %v557_v62  ;;  %v643_v12 = vpop.f32.mrb[9].mxu1 }
 0x13a   : > { %661 = vst.msk [vmem:[%s148_s13] sm:$0xff] %vm660_vm1, %v642_v11 }
 0x13b   : > { %v646_v13 = vpop.f32.mrb[10].mxu1 }
 0x13c   : > { %v647_v14 = vadd.f32 %v646_v13, %v562_v2  ;;  %v648_v15 = vpop.f32.mrb[11].mxu1 }
 0x13e   : > { %662 = vst.msk [vmem:[%s148_s13 + $0x8] sm:$0xff] %vm660_vm1, %v647_v14 }
 0x13f   : > { %v651_v16 = vpop.f32.mrb[12].mxu1 }
 0x140   : > { %v652_v17 = vadd.f32 %v651_v16, %v567_v6  ;;  %v653_v18 = vpop.f32.mrb[13].mxu1 }
 0x142   : > { %663 = vst.msk [vmem:[%s148_s13 + $0x10] sm:$0xff] %vm660_vm1, %v652_v17 }
 0x143   : > { %v656_v19 = vpop.f32.mrb[14].mxu1 }
 0x144   : > { %v657_v20 = vadd.f32 %v656_v19, %v572_v9  ;;  %v658_v21 = vpop.f32.mrb[15].mxu1 }
 0x146   : > { %664 = vst.msk [vmem:[%s148_s13 + $0x18] sm:$0xff] %vm660_vm1, %v657_v20 }
 0x147 PF: > { %s12_s9 = sadd.s32 1, %s1024_s9  }
 0x148   : > { %p9_p4 = scmp.ge.s32.totalorder %s12_s9, 6  }
 0x14a   :  { %11 = sbr.rel (!%p9_p4) target bundleno = 1 (0x1), region = 58 }

</bundles_post_ra>
